<compile_context>
chip_gen: v7x
topology: tpu7x:2x2x1
jax: 0.10.0
libtpu: 0.0.40
codegen_flags: <defaults>
</compile_context>

<pallas_src>
import functools

import jax
import jax.numpy as jnp
from jax.experimental import pallas as pl
from jax.experimental.pallas import tpu as pltpu


_LANE = 128


def _round_up(x, m):
    return ((x + m - 1) // m) * m


def _vmem_limit_bytes():
    """Scoped-VMEM budget derived from the actual chip (v5e/v6e: 128 MiB
    physical, v7x: 64 MiB), with headroom left for Mosaic internals."""
    try:
        phys = int(pltpu.get_tpu_info().vmem_capacity_bytes)
    except Exception:
        phys = 64 * 1024 * 1024           # conservative (v7x) fallback
    return max(32 * 1024 * 1024, (phys * 3) // 4)


_VMEM_LIMIT = _vmem_limit_bytes()


def _im2col(x_nhwc, kh, kw, stride):
    """'same'-padded strided im2col -> (N, Ho, Wo, kh*kw*C), Ho, Wo.
    TODO(synk): replace with in-kernel halo DMA + per-tap accumulation."""
    N, H, W, C = x_nhwc.shape
    pad = kh // 2
    xp = jnp.pad(x_nhwc, ((0, 0), (pad, pad), (pad, pad), (0, 0)))
    Ho = (H + 2 * pad - kh) // stride + 1
    Wo = (W + 2 * pad - kw) // stride + 1
    cols = []
    for i in range(kh):
        for j in range(kw):
            cols.append(xp[:, i:i + stride * Ho:stride,
                           j:j + stride * Wo:stride, :])
    return jnp.concatenate(cols, axis=-1), Ho, Wo


# ----------------------------------------------------------------------------
# Kernel 1: row-tiled conv-as-matmul (im2col patches @ weight) + bias + ReLU.
# bf16 MXU inputs, f32 accumulation / epilogue, bf16 lane-dense store.
# ----------------------------------------------------------------------------
def _conv_matmul_relu_kernel(patches_ref, w_ref, b_ref, o_ref):
    # patches: (tm, Kp) bf16   w: (Kp, Cp) bf16   b: (1, Cp) f32   o: (tm, Cp) bf16
    acc = jnp.dot(patches_ref[...], w_ref[...],
                  preferred_element_type=jnp.float32)
    acc = jnp.maximum(acc + b_ref[...], 0.0)
    o_ref[...] = acc.astype(o_ref.dtype)


def conv2d_relu_pallas(x_nhwc, w, b, stride, tile_m=4096):
    """3x3 'same'-padded strided conv + ReLU.

    The kernel store is lane-dense (Cout padded to 128); the result is
    narrowed back to the real Cout outside the kernel so downstream
    contractions stay compact.  Returns (N, Ho, Wo, Cout) bf16.
    """
    N, H, W, Cin = x_nhwc.shape
    KH, KW, wcin, Cout = w.shape
    assert wcin == Cin
    patches, Ho, Wo = _im2col(x_nhwc, KH, KW, stride)
    M = N * Ho * Wo
    K = KH * KW * Cin
    Kp = _round_up(K, 32)                  # non-ragged bf16 contraction feed
    Cp = _round_up(Cout, _LANE)            # lane-dense (unmasked) store

    pm = jnp.pad(patches.reshape(M, K),
                 ((0, 0), (0, Kp - K))).astype(jnp.bfloat16)
    wm = jnp.pad(w.reshape(K, Cout),
                 ((0, Kp - K), (0, Cp - Cout))).astype(jnp.bfloat16)
    bm = jnp.pad(b.reshape(1, Cout),
                 ((0, 0), (0, Cp - Cout))).astype(jnp.float32)

    # bf16-sublane-friendly row tiles; cap so the "parallel" grid axis has
    # >= 2 points (keeps both v7x TensorCores busy).
    tm = min(tile_m, _round_up(M, 16))
    if _round_up(M, 16) // tm < 2 and M >= 32:
        tm = _round_up(_round_up(M, 16) // 2, 16)
    Mp = _round_up(M, tm)
    if Mp != M:
        pm = jnp.pad(pm, ((0, Mp - M), (0, 0)))   # padded rows sliced off below

    cost = pl.CostEstimate(            # real (unpadded) dims
        flops=2 * M * K * Cout,
        transcendentals=0,
        bytes_accessed=int(M * K * 2 + K * Cout * 2 + Cout * 4 + M * Cout * 2),
    )
    out = pl.pallas_call(
        _conv_matmul_relu_kernel,
        out_shape=jax.ShapeDtypeStruct((Mp, Cp), jnp.bfloat16),
        grid=(Mp // tm,),
        in_specs=[
            pl.BlockSpec((tm, Kp), lambda i: (i, 0)),     # streamed row tiles
            pl.BlockSpec((Kp, Cp), lambda i: (0, 0)),     # VMEM-resident weight
            pl.BlockSpec((1, Cp), lambda i: (0, 0)),      # VMEM-resident bias
        ],
        out_specs=pl.BlockSpec((tm, Cp), lambda i: (i, 0)),
        compiler_params=pltpu.CompilerParams(
            dimension_semantics=("parallel",),
            vmem_limit_bytes=_VMEM_LIMIT),
        cost_estimate=cost,
    )(pm, wm, bm)
    # Narrow to the real channel count outside the kernel (kernel store stays
    # lane-dense; conv2's contraction stays compact).
    return out[:M, :Cout].reshape(N, Ho, Wo, Cout)


# ----------------------------------------------------------------------------
# Kernel 2: conv2 + fused head.  Per batch n, spatial row-tiles are reduced
# into a (1, Cp) f32 VMEM accumulator (global average pool); on the last tile
# the Linear(C,1) is a VPU multiply + lane-sum and the sigmoid is written out.
# The conv2 feature map never touches HBM.
# ----------------------------------------------------------------------------
def _conv_head_kernel(p_ref, w_ref, b_ref, wfc_ref, bfc_ref, o_ref, acc_ref,
                      *, s_valid, tile_s, need_mask):
    t = pl.program_id(1)

    @pl.when(t == 0)
    def _init():
        acc_ref[...] = jnp.zeros_like(acc_ref)

    # conv tile: (tile_s, K) @ (K, Cp) -> f32, bias + ReLU in f32
    x = jnp.dot(p_ref[0], w_ref[...], preferred_element_type=jnp.float32)
    x = jnp.maximum(x + b_ref[...], 0.0)
    if need_mask:
        # mask zero-padded spatial rows (they would contribute ReLU(bias) != 0)
        row = t * tile_s + jax.lax.broadcasted_iota(jnp.int32, (tile_s, 1), 0)
        x = jnp.where(row < s_valid, x, 0.0)
    acc_ref[...] += jnp.sum(x, axis=0, keepdims=True)            # (1, Cp)

    @pl.when(t == pl.num_programs(1) - 1)
    def _finalize():
        pooled = acc_ref[...] * (1.0 / s_valid)                  # avg pool (1, Cp)
        logit = jnp.sum(pooled * wfc_ref[...], axis=-1,
                        keepdims=True) + bfc_ref[0]              # (1, 1), VPU+XLU
        o_ref[...] = jnp.broadcast_to(jax.nn.sigmoid(logit), o_ref.shape)


def conv2d_head_pallas(x_nhwc, w, b, w_fc, b_fc, stride, tile_s=512):
    """Fused: 3x3 strided conv + ReLU + global-avg-pool + Linear(C,1) + sigmoid."""
    N, H, W, Cin = x_nhwc.shape              # Cin is the compact channel count
    KH, KW, wcin, Cout = w.shape
    assert wcin == Cin
    patches, Ho, Wo = _im2col(x_nhwc, KH, KW, stride)
    S = Ho * Wo
    K = KH * KW * Cin                        # compact contraction (no padded lanes)
    Cp = _round_up(Cout, _LANE)

    wm = jnp.pad(w.reshape(K, Cout),
                 ((0, 0), (0, Cp - Cout))).astype(jnp.bfloat16)
    bm = jnp.pad(b.reshape(1, Cout),
                 ((0, 0), (0, Cp - Cout))).astype(jnp.float32)
    wfc = jnp.pad(w_fc.reshape(1, Cout),
                  ((0, 0), (0, Cp - Cout))).astype(jnp.float32)
    bfc = b_fc.reshape(1).astype(jnp.float32)

    ts = min(tile_s, _round_up(S, 16))
    Sp = _round_up(S, ts)
    pm = patches.reshape(N, S, K).astype(jnp.bfloat16)
    if Sp != S:
        pm = jnp.pad(pm, ((0, 0), (0, Sp - S), (0, 0)))

    grid = (N, Sp // ts)
    kernel = functools.partial(_conv_head_kernel, s_valid=S, tile_s=ts,
                               need_mask=(Sp != S))
    cost = pl.CostEstimate(            # real (unpadded) dims
        flops=2 * N * S * K * Cout + 2 * N * Cout,
        transcendentals=N,
        bytes_accessed=int(N * S * K * 2 + K * Cout * 2 + Cout * 8 + N * 4),
    )
    out = pl.pallas_call(
        kernel,
        out_shape=jax.ShapeDtypeStruct((N, 1, _LANE), jnp.float32),
        grid=grid,
        in_specs=[
            pl.BlockSpec((1, ts, K), lambda n, t: (n, t, 0)),   # streamed patches
            pl.BlockSpec((K, Cp), lambda n, t: (0, 0)),         # resident weight
            pl.BlockSpec((1, Cp), lambda n, t: (0, 0)),         # resident bias
            pl.BlockSpec((1, Cp), lambda n, t: (0, 0)),         # resident fc weight
            pl.BlockSpec(memory_space=pltpu.MemorySpace.SMEM),  # fc bias scalar
        ],
        out_specs=pl.BlockSpec((1, 1, _LANE), lambda n, t: (n, 0, 0)),
        scratch_shapes=[pltpu.VMEM((1, Cp), jnp.float32)],      # pooled-sum acc
        compiler_params=pltpu.CompilerParams(
            dimension_semantics=("parallel", "arbitrary"),
            vmem_limit_bytes=_VMEM_LIMIT),
        cost_estimate=cost,
    )(pm, wm, bm, wfc, bfc)
    return out[:, 0, :1]                                        # (N, 1)


# ----------------------------------------------------------------------------
# Full forward: encoder (2 conv+ReLU stages) -> fused head, matching
# ClotModelSingle.forward(x) = head(model(x)).
# ----------------------------------------------------------------------------
def clot_model_single_forward(x_nchw, params):
    x = jnp.transpose(x_nchw, (0, 2, 3, 1)).astype(jnp.bfloat16)  # NCHW -> NHWC
    x = conv2d_relu_pallas(x, params["w1"], params["b1"], stride=2)
    return conv2d_head_pallas(x, params["w2"], params["b2"],
                              params["w_fc"], params["b_fc"], stride=2)


def init_params(key, cin=3, c1=16, c2=32):
    k1, k2, k3 = jax.random.split(key, 3)
    return {
        "w1": 0.1 * jax.random.normal(k1, (3, 3, cin, c1), jnp.float32),
        "b1": jnp.zeros((c1,), jnp.float32),
        "w2": 0.1 * jax.random.normal(k2, (3, 3, c1, c2), jnp.float32),
        "b2": jnp.zeros((c2,), jnp.float32),
        "w_fc": 0.1 * jax.random.normal(k3, (c2,), jnp.float32),
        "b_fc": jnp.zeros((1,), jnp.float32),
    }


if __name__ == "__main__":
    key = jax.random.PRNGKey(0)
    k_in, k_par = jax.random.split(key)
    # Input in PyTorch NCHW convention: batch=2, channels=3, 16x16 image.
    x = jax.random.normal(k_in, (2, 3, 16, 16), jnp.float32)
    params = init_params(k_par)

    fwd = jax.jit(clot_model_single_forward)
    out = jax.block_until_ready(fwd(x, params))
    assert out.shape == (2, 1)
    assert bool(jnp.all((out >= 0.0) & (out <= 1.0)))
    print("KERNEL_OK")
</pallas_src>

<mosaic_0001>
module attributes {stable_mosaic.version = 11 : i64} {
  func.func @_conv_matmul_relu_kernel(%arg0: i32, %arg1: memref<64x32xbf16, #tpu.memory_space<vmem>>, %arg2: memref<32x128xbf16, #tpu.memory_space<vmem>>, %arg3: memref<1x128xf32, #tpu.memory_space<vmem>>, %arg4: memref<64x128xbf16, #tpu.memory_space<vmem>>) attributes {dimension_semantics = [#tpu.dimension_semantics<parallel>], iteration_bounds = array<i64: 2>, scalar_prefetch = 0 : i64, scratch_operands = 0 : i64, tpu.core_type = #tpu.core_type<tc>, window_params = [{transform_indices = @transform_0, window_bounds = array<i64: 64, 32>}, {pipeline_mode = #tpu.pipeline_mode<synchronous>, transform_indices = @transform_1, window_bounds = array<i64: 32, 128>}, {pipeline_mode = #tpu.pipeline_mode<synchronous>, transform_indices = @transform_2, window_bounds = array<i64: 1, 128>}, {transform_indices = @transform_3, window_bounds = array<i64: 64, 128>}]} {
    %c0 = arith.constant 0 : index
    %c0_0 = arith.constant 0 : index
    %0 = vector.load %arg1[%c0, %c0_0] : memref<64x32xbf16, #tpu.memory_space<vmem>>, vector<64x32xbf16>
    %c0_1 = arith.constant 0 : index
    %c0_2 = arith.constant 0 : index
    %1 = vector.load %arg2[%c0_1, %c0_2] : memref<32x128xbf16, #tpu.memory_space<vmem>>, vector<32x128xbf16>
    %cst = arith.constant dense<0.000000e+00> : vector<64x128xf32>
    %2 = tpu.matmul %0, %1, %cst {dimension_numbers = #tpu.dot_dimension_numbers<[1], [0], [0], [1], [0, 0, 1, 1], [], []>} : vector<64x32xbf16>, vector<32x128xbf16>, vector<64x128xf32> -> vector<64x128xf32>
    %c0_3 = arith.constant 0 : index
    %c0_4 = arith.constant 0 : index
    %3 = vector.load %arg3[%c0_3, %c0_4] : memref<1x128xf32, #tpu.memory_space<vmem>>, vector<1x128xf32>
    %4 = vector.broadcast %3 : vector<1x128xf32> to vector<64x128xf32>
    %5 = arith.addf %2, %4 : vector<64x128xf32>
    %cst_5 = arith.constant 0.000000e+00 : f32
    %6 = vector.broadcast %cst_5 : f32 to vector<64x128xf32>
    %7 = arith.maximumf %5, %6 : vector<64x128xf32>
    %8 = arith.truncf %7 : vector<64x128xf32> to vector<64x128xbf16>
    %c0_6 = arith.constant 0 : index
    %c0_7 = arith.constant 0 : index
    %9 = vector.load %arg4[%c0_6, %c0_7] : memref<64x128xbf16, #tpu.memory_space<vmem>>, vector<64x128xbf16>
    tpu.vector_store %arg4[%c0_6, %c0_7], %8 {strides = array<i32>} : memref<64x128xbf16, #tpu.memory_space<vmem>>, vector<64x128xbf16>,
    return
  }
  func.func @transform_0(%arg0: i32) -> (i32, i32) {
    %c0_i32 = arith.constant 0 : i32
    %c0_i32_0 = arith.constant 0 : i32
    return %arg0, %c0_i32 : i32, i32
  }
  func.func @transform_1(%arg0: i32) -> (i32, i32) {
    %c0_i32 = arith.constant 0 : i32
    %c0_i32_0 = arith.constant 0 : i32
    %c0_i32_1 = arith.constant 0 : i32
    return %c0_i32, %c0_i32_0 : i32, i32
  }
  func.func @transform_2(%arg0: i32) -> (i32, i32) {
    %c0_i32 = arith.constant 0 : i32
    %c0_i32_0 = arith.constant 0 : i32
    %c0_i32_1 = arith.constant 0 : i32
    return %c0_i32, %c0_i32_0 : i32, i32
  }
  func.func @transform_3(%arg0: i32) -> (i32, i32) {
    %c0_i32 = arith.constant 0 : i32
    %c0_i32_0 = arith.constant 0 : i32
    return %arg0, %c0_i32 : i32, i32
  }
}

module attributes {stable_mosaic.version = 11 : i64} {
  func.func @_conv_head_kernel(%arg0: i32, %arg1: i32, %arg2: memref<1x16x144xbf16, #tpu.memory_space<vmem>>, %arg3: memref<144x128xbf16, #tpu.memory_space<vmem>>, %arg4: memref<1x128xf32, #tpu.memory_space<vmem>>, %arg5: memref<1x128xf32, #tpu.memory_space<vmem>>, %arg6: memref<1xf32, #tpu.memory_space<smem>>, %arg7: memref<1x1x128xf32, #tpu.memory_space<vmem>>, %arg8: memref<1x128xf32, #tpu.memory_space<vmem>>) attributes {dimension_semantics = [#tpu.dimension_semantics<parallel>, #tpu.dimension_semantics<arbitrary>], iteration_bounds = array<i64: 2, 1>, scalar_prefetch = 0 : i64, scratch_operands = 1 : i64, tpu.core_type = #tpu.core_type<tc>, window_params = [{transform_indices = @transform_0, window_bounds = array<i64: 1, 16, 144>}, {pipeline_mode = #tpu.pipeline_mode<synchronous>, transform_indices = @transform_1, window_bounds = array<i64: 144, 128>}, {pipeline_mode = #tpu.pipeline_mode<synchronous>, transform_indices = @transform_2, window_bounds = array<i64: 1, 128>}, {pipeline_mode = #tpu.pipeline_mode<synchronous>, transform_indices = @transform_3, window_bounds = array<i64: 1, 128>}, {transform_indices = @transform_4, window_bounds = array<i64: 1>}, {transform_indices = @transform_5, window_bounds = array<i64: 1, 1, 128>}]} {
    %c0_i32 = arith.constant 0 : i32
    %0 = arith.cmpi eq, %arg1, %c0_i32 : i32
    %1 = arith.extui %0 : i1 to i32
    %c0_i32_0 = arith.constant 0 : i32
    %2 = arith.cmpi ne, %1, %c0_i32_0 : i32
    scf.if %2 {
      %cst_15 = arith.constant 0.000000e+00 : f32
      %20 = vector.broadcast %cst_15 : f32 to vector<1x128xf32>
      %c0_16 = arith.constant 0 : index
      %c0_17 = arith.constant 0 : index
      %21 = vector.load %arg8[%c0_16, %c0_17] : memref<1x128xf32, #tpu.memory_space<vmem>>, vector<1x128xf32>
      tpu.vector_store %arg8[%c0_16, %c0_17], %20 {strides = array<i32>} : memref<1x128xf32, #tpu.memory_space<vmem>>, vector<1x128xf32>,
    } else {
    }
    %c0 = arith.constant 0 : index
    %c0_1 = arith.constant 0 : index
    %c0_2 = arith.constant 0 : index
    %3 = vector.load %arg2[%c0, %c0_1, %c0_2] : memref<1x16x144xbf16, #tpu.memory_space<vmem>>, vector<1x16x144xbf16>
    %4 = vector.shape_cast %3 : vector<1x16x144xbf16> to vector<16x144xbf16>
    %c0_3 = arith.constant 0 : index
    %c0_4 = arith.constant 0 : index
    %5 = vector.load %arg3[%c0_3, %c0_4] : memref<144x128xbf16, #tpu.memory_space<vmem>>, vector<144x128xbf16>
    %cst = arith.constant dense<0.000000e+00> : vector<16x128xf32>
    %6 = tpu.matmul %4, %5, %cst {dimension_numbers = #tpu.dot_dimension_numbers<[1], [0], [0], [1], [0, 0, 1, 1], [], []>} : vector<16x144xbf16>, vector<144x128xbf16>, vector<16x128xf32> -> vector<16x128xf32>
    %c0_5 = arith.constant 0 : index
    %c0_6 = arith.constant 0 : index
    %7 = vector.load %arg4[%c0_5, %c0_6] : memref<1x128xf32, #tpu.memory_space<vmem>>, vector<1x128xf32>
    %8 = vector.broadcast %7 : vector<1x128xf32> to vector<16x128xf32>
    %9 = arith.addf %6, %8 : vector<16x128xf32>
    %cst_7 = arith.constant 0.000000e+00 : f32
    %10 = vector.broadcast %cst_7 : f32 to vector<16x128xf32>
    %11 = arith.maximumf %9, %10 : vector<16x128xf32>
    %c0_8 = arith.constant 0 : index
    %c0_9 = arith.constant 0 : index
    %12 = vector.load %arg8[%c0_8, %c0_9] : memref<1x128xf32, #tpu.memory_space<vmem>>, vector<1x128xf32>
    %cst_10 = arith.constant dense<0.000000e+00> : vector<128xf32>
    %13 = vector.multi_reduction <add>, %11, %cst_10 [0] : vector<16x128xf32> to vector<128xf32>
    %14 = vector.shape_cast %13 : vector<128xf32> to vector<1x128xf32>
    %15 = arith.addf %12, %14 : vector<1x128xf32>
    %c0_11 = arith.constant 0 : index
    %c0_12 = arith.constant 0 : index
    %16 = vector.load %arg8[%c0_11, %c0_12] : memref<1x128xf32, #tpu.memory_space<vmem>>, vector<1x128xf32>
    tpu.vector_store %arg8[%c0_11, %c0_12], %15 {strides = array<i32>} : memref<1x128xf32, #tpu.memory_space<vmem>>, vector<1x128xf32>,
    %c0_i32_13 = arith.constant 0 : i32
    %17 = arith.cmpi eq, %arg1, %c0_i32_13 : i32
    %18 = arith.extui %17 : i1 to i32
    %c0_i32_14 = arith.constant 0 : i32
    %19 = arith.cmpi ne, %18, %c0_i32_14 : i32
    scf.if %19 {
      %c0_15 = arith.constant 0 : index
      %c0_16 = arith.constant 0 : index
      %20 = vector.load %arg8[%c0_15, %c0_16] : memref<1x128xf32, #tpu.memory_space<vmem>>, vector<1x128xf32>
      %cst_17 = arith.constant 6.250000e-02 : f32
      %21 = vector.broadcast %cst_17 : f32 to vector<1x128xf32>
      %22 = arith.mulf %20, %21 : vector<1x128xf32>
      %c0_18 = arith.constant 0 : index
      %c0_19 = arith.constant 0 : index
      %23 = vector.load %arg5[%c0_18, %c0_19] : memref<1x128xf32, #tpu.memory_space<vmem>>, vector<1x128xf32>
      %24 = arith.mulf %22, %23 : vector<1x128xf32>
      %cst_20 = arith.constant dense<0.000000e+00> : vector<1xf32>
      %25 = vector.multi_reduction <add>, %24, %cst_20 [1] : vector<1x128xf32> to vector<1xf32>
      %26 = vector.shape_cast %25 : vector<1xf32> to vector<1x1xf32>
      %c0_21 = arith.constant 0 : index
      %27 = memref.load %arg6[%c0_21] : memref<1xf32, #tpu.memory_space<smem>>
      %28 = vector.broadcast %27 : f32 to vector<1x1xf32>
      %29 = arith.addf %26, %28 : vector<1x1xf32>
      %30 = arith.negf %29 : vector<1x1xf32>
      %31 = math.exp %30 : vector<1x1xf32>
      %cst_22 = arith.constant 1.000000e+00 : f32
      %32 = vector.broadcast %cst_22 : f32 to vector<1x1xf32>
      %33 = arith.addf %32, %31 : vector<1x1xf32>
      %34 = arith.divf %32, %33 : vector<1x1xf32>
      %35 = vector.shape_cast %34 : vector<1x1xf32> to vector<1x1x1xf32>
      %36 = vector.broadcast %35 : vector<1x1x1xf32> to vector<1x1x128xf32>
      %c0_23 = arith.constant 0 : index
      %c0_24 = arith.constant 0 : index
      %c0_25 = arith.constant 0 : index
      %37 = vector.load %arg7[%c0_23, %c0_24, %c0_25] : memref<1x1x128xf32, #tpu.memory_space<vmem>>, vector<1x1x128xf32>
      tpu.vector_store %arg7[%c0_23, %c0_24, %c0_25], %36 {strides = array<i32>} : memref<1x1x128xf32, #tpu.memory_space<vmem>>, vector<1x1x128xf32>,
    } else {
    }
    return
  }
  func.func @transform_0(%arg0: i32, %arg1: i32) -> (i32, i32, i32) {
    %c0_i32 = arith.constant 0 : i32
    %c0_i32_0 = arith.constant 0 : i32
    return %arg0, %arg1, %c0_i32 : i32, i32, i32
  }
  func.func @transform_1(%arg0: i32, %arg1: i32) -> (i32, i32) {
    %c0_i32 = arith.constant 0 : i32
    %c0_i32_0 = arith.constant 0 : i32
    %c0_i32_1 = arith.constant 0 : i32
    return %c0_i32, %c0_i32_0 : i32, i32
  }
  func.func @transform_2(%arg0: i32, %arg1: i32) -> (i32, i32) {
    %c0_i32 = arith.constant 0 : i32
    %c0_i32_0 = arith.constant 0 : i32
    %c0_i32_1 = arith.constant 0 : i32
    return %c0_i32, %c0_i32_0 : i32, i32
  }
  func.func @transform_3(%arg0: i32, %arg1: i32) -> (i32, i32) {
    %c0_i32 = arith.constant 0 : i32
    %c0_i32_0 = arith.constant 0 : i32
    %c0_i32_1 = arith.constant 0 : i32
    return %c0_i32, %c0_i32_0 : i32, i32
  }
  func.func @transform_4(%arg0: i32, %arg1: i32) -> i32 {
    %c0_i32 = arith.constant 0 : i32
    %c0_i32_0 = arith.constant 0 : i32
    return %c0_i32 : i32
  }
  func.func @transform_5(%arg0: i32, %arg1: i32) -> (i32, i32, i32) {
    %c0_i32 = arith.constant 0 : i32
    %c0_i32_0 = arith.constant 0 : i32
    %c0_i32_1 = arith.constant 0 : i32
    return %arg0, %c0_i32, %c0_i32_0 : i32, i32, i32
  }
}

</mosaic_0001>

<bundles_post_ra>
// kernel: clot_model_single_forward.2
= control target key start
LH: loop header
LB: loop body
LE: loop exit
PB: predicated region body
PF: predicated region fallthrough
CT: control target
= control target key end

     0   :  { %s533_s12 = smov 0   ;;  %s566_s0 = inlined_call_operand.vmem [shape: bf16[128,32], index: 0, kind: input, shape index: {}]   ;;  %s567_s1 = inlined_call_operand.vmem [shape: bf16[32,128], index: 1, kind: input, shape index: {}]   ;;  %s568_s2 = inlined_call_operand.vmem [shape: f32[1,128], index: 2, kind: input, shape index: {}]   ;;  %s569_s3 = inlined_call_operand.vmem [shape: bf16[128,128], index: 3, kind: output, shape index: {}]  }
   0x1 LB: > { %s408_s13 = sadd.s32 4294967295, %s511_s12   ;;  %p412_p0 = scmp.ge.s32.totalorder %s511_s12, 1  ;;  %s511_s12 = sphi %s533_s12, %s13_s12  }
   0x2   : > { %p138_p1 = scmp.lt.s32.totalorder %s511_s12, 3 }
   0x4   : > { %p139_p2 = pnand %p412_p0, %p138_p1 }
   0x5   : > { %v499_v0 = vld [vmem:[%s567_s1] sm:$0xff] (!%p139_p2)   ;;  %s413_s16 = sshll.u32 (!%p139_p2), %s408_s13, 3  ;;  %v500_v1 = vld [vmem:[%s567_s1 + $0x8] sm:$0xff] (!%p139_p2)   ;;  %vm226_vm0 = vcmask (!%p139_p2), 261120  }
   0x6   : > { %142 = sbr.rel (%p139_p2) target bundleno = 240 (0xf0), region = 32  ;;  %p163_p3 = scmp.lt.s32.totalorder (!%p139_p2), %s413_s16, 15  ;;  %475 = vmatprep.subr.bf16.mxu0 (!%p139_p2), %v499_v0  ;;  %487 = vmatprep.subr.bf16.mxu1 (!%p139_p2), %v499_v0  ;;  %v417_v6 = vld [vmem:[%s568_s2] ss:$0 sm:$0xff] (!%p139_p2) }
   0x7   : > { %476 = vmatpush3.bf16.msra.mxu0 (!%p139_p2), %v499_v0  ;;  %489 = vmatpush3.bf16.msra.mxu1 (!%p139_p2), %v499_v0 }
   0x8   : > { %477 = vmatprep.subr.bf16.mxu0 (!%p139_p2), %v500_v1  ;;  %488 = vmatprep.subr.bf16.mxu1 (!%p139_p2), %v500_v1 }
   0xb   : > { %478 = vmatpush3.bf16.msra.mxu0 (!%p139_p2), %v500_v1  ;;  %490 = vmatpush3.bf16.msra.mxu1 (!%p139_p2), %v500_v1 }
   0xd   : > { %s571_s16 = smov (!%p163_p3, %s413_s16), 15 }
   0xe   : > { %s414_s19 = sshll.u32 %s571_s16, 2 }
   0xf   : > { %s166_s22 = scalar_lea.vmem %s566_s0, %s414_s19  ;;  %s172_s27 = scalar_lea.vmem %s569_s3, %s414_s19 }
  0x10   : > { %v501_v2 = vld [vmem:[%s166_s22] sm:$0xff]   ;;  %v502_v3 = vld [vmem:[%s166_s22 + $0x10] sm:$0xff]   ;;  %v503_v4 = vld [vmem:[%s166_s22 + $0x8] sm:$0xff]  }
  0x11   : > { %479 = vmatprep.mubr.msk.bf16.mxu0 %vm226_vm0, %v501_v2  ;;  %483 = vmatprep.mubr.msk.bf16.mxu1 %vm226_vm0, %v502_v3  ;;  %v504_v5 = vld [vmem:[%s166_s22 + $0x18] sm:$0xff]  }
  0x12   : > { %480 = vmatmul.mubr.msk.bf16.vlgmr.msra.gmra.mrb[0].mxu0 %vm226_vm0, %v503_v4  ;;  %484 = vmatmul.mubr.msk.bf16.vlgmr.msra.gmra.mrb[0].mxu1 %vm226_vm0, %v504_v5 }
  0xe5   : > { %v481_v7 = vpop.f32.mrb[0].mxu0  ;;  %v485_v9 = vpop.f32.mrb[0].mxu1 }
  0xe6   : > { %v282_v8 = vadd.f32 %v481_v7, %v417_v6  ;;  %v273_v10 = vpop.f32.mrb[1].mxu0  ;;  %v298_v11 = vadd.f32 %v485_v9, %v417_v6  ;;  %v289_v13 = vpop.f32.mrb[1].mxu1 }
  0xe7   : > { %v274_v12 = vadd.f32 %v417_v6, %v273_v10  ;;  %v482_v14 = vpop.f32.mrb[2].mxu0  ;;  %v290_v15 = vadd.f32 %v417_v6, %v289_v13  ;;  %v486_v17 = vpop.f32.mrb[2].mxu1 }
  0xe8   : > { %v285_v16 = vadd.f32 %v482_v14, %v417_v6  ;;  %v276_v18 = vpop.f32.mrb[3].mxu0  ;;  %v301_v19 = vadd.f32 %v486_v17, %v417_v6  ;;  %v292_v21 = vpop.f32.mrb[3].mxu1  ;;  %v306_v22 = vmax.f32 %v282_v8, 0.0  ;;  %v310_v25 = vmax.f32 %v298_v11, 0.0 }
  0xe9   : > { %v277_v20 = vadd.f32 %v417_v6, %v276_v18  ;;  %v293_v24 = vadd.f32 %v417_v6, %v292_v21  ;;  %v304_v26 = vmax.f32 %v274_v12, 0.0  ;;  %v308_v29 = vmax.f32 %v290_v15, 0.0 }
  0xea   : > { %v307_v23 = vmax.f32 %v285_v16, 0.0  ;;  %v311_v27 = vmax.f32 %v301_v19, 0.0 }
  0xeb   : > { %v305_v28 = vmax.f32 %v277_v20, 0.0  ;;  %v309_v31 = vmax.f32 %v293_v24, 0.0 }
  0xec   : > { %v454_v30 = vpack.c.bf16 %v307_v23, %v306_v22  ;;  %v464_v32 = vpack.c.bf16 %v311_v27, %v310_v25 }
  0xed   : > { %v449_v33 = vpack.c.bf16 %v305_v28, %v304_v26  ;;  %v459_v34 = vpack.c.bf16 %v309_v31, %v308_v29 }
  0xee   : > { %466 = vst [vmem:[%s172_s27 + $0x8] sm:$0xff] %v454_v30   ;;  %468 = vst [vmem:[%s172_s27 + $0x18] sm:$0xff] %v464_v32  }
  0xef   : > { %450 = vst [vmem:[%s172_s27] sm:$0xff] %v449_v33   ;;  %467 = vst [vmem:[%s172_s27 + $0x10] sm:$0xff] %v459_v34  }
  0xf0 PF: > { %s13_s12 = sadd.s32 1, %s511_s12  }
  0xf1   : > { %p10_p4 = scmp.ge.s32.totalorder %s13_s12, 4  }
  0xf3   :  { %12 = sbr.rel (!%p10_p4) target bundleno = 1 (0x1), region = 62 }

// kernel: clot_model_single_forward.3
= control target key start
LH: loop header
LB: loop body
LE: loop exit
PB: predicated region body
PF: predicated region fallthrough
CT: control target
= control target key end

     0   :  { %s616_s20 = smov 0   ;;  %s618_s21 = smov 0   ;;  %s686_s0 = inlined_call_operand.vmem [shape: bf16[2,16,144], index: 0, kind: input, shape index: {}]   ;;  %s687_s1 = inlined_call_operand.vmem [shape: bf16[144,128], index: 1, kind: input, shape index: {}]   ;;  %s688_s2 = inlined_call_operand.vmem [shape: f32[1,128], index: 2, kind: input, shape index: {}]   ;;  %s689_s3 = inlined_call_operand.vmem [shape: f32[1,128], index: 3, kind: input, shape index: {}]   ;;  %s690_s4 = inlined_call_operand.<no memory space> [shape: f32[1], index: 4, kind: input, shape index: {}]   ;;  %s691_s5 = inlined_call_operand.vmem [shape: f32[2,1,128], index: 5, kind: output, shape index: {}]  }
   0x1   :  { %10 = sst [smem:[#allocation3]] %s690_s4  ;;  %s620_s22 = smov 0  }
   0x2 LB: > { %s28_s4 = sadd.s32 1, %s575_s21  ;;  %p495_p0 = scmp.ge.s32.totalorder %s579_s22, 1  ;;  %s579_s22 = sphi %s620_s22, %s16_s22   ;;  %s575_s21 = sphi %s618_s21, %s693_s21   ;;  %s571_s20 = sphi %s616_s20, %s692_s20  }
   0x3   : > { %p30_p1 = scmp.ge.s32.totalorder %s28_s4, 2  ;;  %p208_p2 = scmp.lt.s32.totalorder %s579_s22, 3 }
   0x5   : > { %s695_s4 = smov (%p30_p1, %s28_s4), 0  ;;  %p209_p3 = pnand %p495_p0, %p208_p2 }
   0x6   : > { %v541_v0 = vld [vmem:[%s687_s1] sm:$0xff] (!%p209_p3)   ;;  %v581_v1 = vmov (!%p209_p3), 0   ;;  %p240_p4 = scmp.lt.s32.totalorder (!%p209_p3), %s571_s20, 1  ;;  %v542_v2 = vld [vmem:[%s687_s1 + $0x8] sm:$0xff] (!%p209_p3)   ;;  %v543_v3 = vld [vmem:[%s687_s1 + $0x10] sm:$0xff] (!%p209_p3)   ;;  %vm349_vm0 = vcmask (!%p209_p3), 130048  }
   0x7   : > { %212 = sbr.rel (%p209_p3) target bundleno = 461 (0x1cd), region = 40  ;;  %353 = vmatprep.subr.bf16.mxu0 (!%p209_p3), %v581_v1  ;;  %v544_v4 = vld [vmem:[%s687_s1 + $0x18] sm:$0xff] (!%p209_p3)   ;;  %v545_v6 = vld [vmem:[%s687_s1 + $0x20] sm:$0xff] (!%p209_p3)   ;;  %v546_v7 = vld [vmem:[%s687_s1 + $0x28] sm:$0xff] (!%p209_p3)   ;;  %v582_v12 = vmov (!%p209_p3), 0.0   ;;  %vm413_vm1 = vcmask (!%p209_p3), 1040384  }
   0x8   : > { %354 = vmatpush1.bf16.msra.mxu0 (!%p209_p3), %v541_v0  ;;  %v547_v8 = vld [vmem:[%s687_s1 + $0x30] sm:$0xff] (!%p209_p3)   ;;  %v548_v9 = vld [vmem:[%s687_s1 + $0x38] sm:$0xff] (!%p209_p3)   ;;  %v549_v10 = vld [vmem:[%s687_s1 + $0x40] sm:$0xff] (!%p209_p3)   ;;  %258 = vst [vmem:[#allocation2] sm:$0x1] (!%p209_p3), %v582_v12 }
   0x9   : > { %355 = vmatprep.subr.bf16.mxu0 (!%p209_p3), %v581_v1  ;;  %v498_v13 = vld [vmem:[%s688_s2] ss:$0 sm:$0xff] (!%p209_p3) }
   0xa   : > { %v411_v32 = vld [vmem:[%s689_s3] sm:$0x1] (!%p209_p3) }
   0xc   : > { %356 = vmatpush1.bf16.msra.mxu0 (!%p209_p3), %v542_v2 }
   0xd   : > { %357 = vmatprep.subr.bf16.mxu0 (!%p209_p3), %v581_v1 }
   0xe   : > { %s697_s20 = smov (!%p240_p4, %s571_s20), 1 }
   0xf   : > { %s514_s27 = sshll.u32 %s697_s20, 4  ;;  %v396_v28 = vld [vmem:[#allocation2] sm:$0x1]  ;;  %s252_s30 = scalar_lea.vmem %s691_s5, %s697_s20 }
  0x10   : > { %s248_s7 = scalar_lea.vmem %s686_s0, %s514_s27  ;;  %358 = vmatpush1.bf16.msra.mxu0 %v543_v3  ;;  %s417_s27 = sld [smem:[#allocation3]] }
  0x11   : > { %v552_v5 = vld [vmem:[%s248_s7 + $0x4] ss:$8 sps:$4 sm:$0xff]   ;;  %359 = vmatprep.subr.bf16.mxu0 %v581_v1  ;;  %v550_v11 = vld [vmem:[%s248_s7] ss:$8 sps:$4 sm:$0xff]  }
  0x12   : > { %510 = vmatprep.mubr.msk.bf16.mxu0 %vm349_vm0, %v552_v5 }
  0x14   : > { %360 = vmatpush1.bf16.msra.mxu0 %v544_v4 }
  0x15   : > { %361 = vmatprep.subr.bf16.mxu0 %v581_v1 }
  0x16   : > { %v418_v36 = vstv %s417_s27 }
  0x18   : > { %362 = vmatpush1.bf16.msra.mxu0 %v545_v6 }
  0x19   : > { %363 = vmatprep.subr.bf16.mxu0 %v581_v1 }
  0x1c   : > { %364 = vmatpush1.bf16.msra.mxu0 %v546_v7 }
  0x1d   : > { %365 = vmatprep.subr.bf16.mxu0 %v581_v1 }
  0x20   : > { %366 = vmatpush1.bf16.msra.mxu0 %v547_v8 }
  0x21   : > { %367 = vmatprep.subr.bf16.mxu0 %v581_v1 }
  0x24   : > { %368 = vmatpush1.bf16.msra.mxu0 %v548_v9 }
  0x25   : > { %369 = vmatprep.subr.bf16.mxu0 %v581_v1 }
  0x28   : > { %370 = vmatpush1.bf16.msra.mxu0 %v549_v10 }
  0x2b   : > { %386 = vmatmul.mubr.bf16.vlgmr.msra.gmra.mrb[0].mxu0 %v550_v11 }
  0xfe   : > { %v387_v14 = vpop.f32.mrb[0].mxu0 }
  0xff   : > { %v388_v15 = vadd.f32 %v498_v13, %v387_v14  ;;  %v389_v16 = vpop.f32.mrb[1].mxu0 }
 0x100   : > { %v390_v17 = vpop.f32.mrb[2].mxu0 }
 0x101   : > { %v391_v18 = vadd.f32 %v498_v13, %v390_v17  ;;  %v392_v19 = vpop.f32.mrb[3].mxu0  ;;  %v394_v20 = vmax.f32 %v388_v15, 0.0 }
 0x103   : > { %v395_v21 = vmax.f32 %v391_v18, 0.0 }
 0x105   : > { %v397_v22 = vadd.f32 %v395_v21, %v394_v20 }
 0x107   : > { %v398_v23 = vrot.slane %v397_v22, 4 }
 0x109   : > { %v399_v24 = vadd.f32 %v398_v23, %v397_v22 }
 0x10b   : > { %v400_v25 = vrot.slane %v399_v24, 2 }
 0x10d   : > { %v401_v26 = vadd.f32 %v400_v25, %v399_v24 }
 0x10f   : > { %v402_v27 = vrot.slane %v401_v26, 1 }
 0x111   : > { %v403_v29 = vadd.f32 %v402_v27, %v401_v26 }
 0x113   : > { %v404_v30 = vadd.f32 %v403_v29, %v396_v28 }
 0x115   : > { %405 = vst [vmem:[#allocation2] sm:$0x1] %v404_v30 }
 0x11c   : > { %v409_v31 = vld [vmem:[#allocation2] sm:$0x1] }
 0x11d   : > { %v410_v33 = vmul.f32 0.0625, %v409_v31 }
 0x11f   : > { %v412_v34 = vmul.f32 %v411_v32, %v410_v33 }
 0x121   : > { %v414_v35 = vsel %vm413_vm1, %v412_v34, 0.0 }
 0x122   : > { %415 = vadd.xlane.f32.xlu0 %v414_v35 }
 0x1af   : > { %v416_v37 = vpop.xlane.xlu0 %415 }
 0x1b0   : > { %v419_v38 = vadd.f32 %v418_v36, %v416_v37 }
 0x1b2   : > { %v511_v39 = vmul.f32 -1.442695, %v419_v38 }
 0x1b4   : > { %553 = vpow2.f32 %v511_v39 }
 0x1be   : > { %v554_v40 = vpop.eup %553 }
 0x1bf   : > { %v423_v41 = vadd.f32 1.0, %v554_v40 }
 0x1c1   : > { %555 = vrcp.f32 %v423_v41 }
 0x1cb   : > { %v556_v42 = vpop.eup %555 }
 0x1cc   : > { %426 = vst [vmem:[%s252_s30] sm:$0x1] %v556_v42 }
 0x1cd PF: > { %s16_s22 = sadd.s32 1, %s579_s22   ;;  %s692_s20 = smov %s575_s21 }
 0x1ce   : > { %p13_p5 = scmp.ge.s32.totalorder %s16_s22, 4   ;;  %s693_s21 = smov %s695_s4 }
 0x1d0   :  { %15 = sbr.rel (!%p13_p5) target bundleno = 2 (0x2), region = 78 }

</bundles_post_ra>
